<compile_context>
chip_gen: v6e
topology: v6e:2x2x1
jax: 0.10.0
libtpu: 0.0.40
codegen_flags: <defaults>
</compile_context>

<pallas_src>
import numpy as np
import jax
import jax.numpy as jnp
from jax.experimental import pallas as pl
from jax.experimental.pallas import tpu as pltpu


def _round_up(x, m):
    return ((x + m - 1) // m) * m


def _score_kernel(x_ref, et_ref, out_ref):
    # (TB, d1) @ (d1, TN) on the MXU with f32 accumulation; sigmoid on the
    # EUP (free slot); lane-dense (TN multiple of 128) store.
    s = jnp.dot(x_ref[...], et_ref[...], preferred_element_type=jnp.float32)
    out_ref[...] = jax.nn.sigmoid(s).astype(out_ref.dtype)


def prepare_tucker_params(E, R, W,
                          bn0_gamma, bn0_beta, bn0_mean, bn0_var,
                          bn1_gamma, bn1_beta, bn1_mean, bn1_var,
                          eps=1e-5,
                          param_dtype=jnp.bfloat16,
                          entity_tile=2048):
    """Parameter-only preprocessing.  Call ONCE per model and reuse the result
    across forward calls (keeps the E transpose/pad and BN folding off the
    per-inference hot path)."""
    ne, d1 = E.shape
    d2 = R.shape[1]

    # eval-mode BatchNorm1d folded to affine scale/bias.
    s0 = bn0_gamma * jax.lax.rsqrt(bn0_var + eps)
    b0 = bn0_beta - bn0_mean * s0
    s1 = bn1_gamma * jax.lax.rsqrt(bn1_var + eps)
    b1 = bn1_beta - bn1_mean * s1

    # Fold the bn1 scale into the core tensor's output axis.
    w_s = (W * s1[None, None, :]).astype(param_dtype)            # (d2, d1, d1)

    # Pre-transposed, lane-padded entity table for the scoring matmul.
    TN = min(int(entity_tile), _round_up(ne, 128))
    TN = _round_up(TN, 128)
    NEp = _round_up(ne, TN)
    et_p = jnp.zeros((d1, NEp), param_dtype).at[:, :ne].set(E.T.astype(param_dtype))

    return dict(E=jnp.asarray(E, jnp.float32), R=jnp.asarray(R, jnp.float32),
                w_s=w_s, et_p=et_p,
                s0=s0, b0=b0, b1=b1,
                ne=ne, d1=d1, d2=d2, NEp=NEp, TN=TN,
                param_dtype=param_dtype)


def tucker_forward(e1_idx, r_idx, params, *,
                   batch_tile=128,
                   out_dtype=jnp.float32):     # use jnp.bfloat16 for ranking-only eval
    ne, d1 = params["ne"], params["d1"]
    NEp, TN = params["NEp"], params["TN"]
    pdt = params["param_dtype"]
    B = e1_idx.shape[0]

    # ---------------- per-call glue (plain JAX) -----------------------------
    e1 = jnp.take(params["E"], e1_idx, axis=0)                   # (B, d1)
    r = jnp.take(params["R"], r_idx, axis=0)                     # (B, d2)
    x0 = e1 * params["s0"][None, :] + params["b0"][None, :]      # bn0 (eval)

    # Bilinear projection x[b,j] = sum_{k,i} r[b,k] x0[b,i] W[k,i,j] * s1[j].
    # Output is only (B, d1), so this is left to an XLA matmul (avoids the
    # (B, d2*d1) HBM tensor and the resident core tensor in kernel VMEM).
    x = jnp.einsum('bk,bi,kij->bj',
                   r.astype(pdt), x0.astype(pdt), params["w_s"],
                   preferred_element_type=jnp.float32)
    x = (x + params["b1"][None, :]).astype(pdt)                  # bn1 bias
    # input_dropout / hidden_dropout1 / hidden_dropout2 are identity in eval.

    # ---------------- padding / tiling --------------------------------------
    row_mult = 16 if jnp.dtype(pdt).itemsize < 4 else 8          # bf16 packs 16 sublanes
    TB = batch_tile if B >= batch_tile else _round_up(B, row_mult)
    Bp = _round_up(B, TB)
    x_p = jnp.zeros((Bp, d1), pdt).at[:B].set(x)

    et_p = params["et_p"]
    isz = jnp.dtype(pdt).itemsize
    osz = jnp.dtype(out_dtype).itemsize

    # VMEM: double-buffered X / E^T / out blocks (all small -- no resident
    # core tensor, no (TB, K) outer-product block).
    vmem_est = 2 * TB * d1 * isz + 2 * d1 * TN * isz + 2 * TB * TN * osz
    vmem_limit = int(min(56 * 1024 * 1024, max(16 * 1024 * 1024, 4 * vmem_est)))

    cost = pl.CostEstimate(
        flops=2 * Bp * d1 * NEp,
        transcendentals=Bp * NEp,
        # E^T is streamed exactly once (entity axis outermost); X is re-read
        # once per entity tile (tiny); plus the output writeback.
        bytes_accessed=int(et_p.size * isz
                           + (NEp // TN) * Bp * d1 * isz
                           + Bp * NEp * osz),
    )

    out = pl.pallas_call(
        _score_kernel,
        out_shape=jax.ShapeDtypeStruct((Bp, NEp), out_dtype),
        grid=(NEp // TN, Bp // TB),   # entity axis OUTER: E^T streamed once total
        in_specs=[
            pl.BlockSpec((TB, d1), lambda j, b: (b, 0)),   # projected batch tile
            pl.BlockSpec((d1, TN), lambda j, b: (0, j)),   # E^T entity tile
        ],
        out_specs=pl.BlockSpec((TB, TN), lambda j, b: (b, j)),
        compiler_params=pltpu.CompilerParams(
            dimension_semantics=("parallel", "parallel"),
            vmem_limit_bytes=vmem_limit),
        cost_estimate=cost,
    )(x_p, et_p)

    return out[:B, :ne]


def tucker_reference(e1_idx, r_idx, E, R, W,
                     bn0_gamma, bn0_beta, bn0_mean, bn0_var,
                     bn1_gamma, bn1_beta, bn1_mean, bn1_var,
                     eps=1e-5):
    d1 = E.shape[1]
    d2 = R.shape[1]
    e1 = E[e1_idx]
    x = (e1 - bn0_mean) / jnp.sqrt(bn0_var + eps) * bn0_gamma + bn0_beta
    r = R[r_idx]
    w_mat = (r @ W.reshape(d2, -1)).reshape(-1, d1, d1)
    x = jnp.einsum('bi,bij->bj', x, w_mat)
    x = (x - bn1_mean) / jnp.sqrt(bn1_var + eps) * bn1_gamma + bn1_beta
    return jax.nn.sigmoid(x @ E.T)


if __name__ == "__main__":
    # Small, TuckER-consistent synthetic shapes.
    num_entities, num_relations = 64, 12
    d1, d2 = 32, 16
    B = 4

    key = jax.random.PRNGKey(0)
    ks = jax.random.split(key, 12)

    E = jax.random.normal(ks[0], (num_entities, d1), jnp.float32) * 0.3
    R = jax.random.normal(ks[1], (num_relations, d2), jnp.float32) * 0.3
    W = jax.random.uniform(ks[2], (d2, d1, d1), jnp.float32, minval=-1.0, maxval=1.0)

    # Non-trivial BatchNorm1d parameters / running stats (eval mode).
    bn0_gamma = 1.0 + 0.1 * jax.random.normal(ks[3], (d1,), jnp.float32)
    bn0_beta = 0.1 * jax.random.normal(ks[4], (d1,), jnp.float32)
    bn0_mean = 0.1 * jax.random.normal(ks[5], (d1,), jnp.float32)
    bn0_var = 1.0 + 0.2 * jax.random.uniform(ks[6], (d1,), jnp.float32)
    bn1_gamma = 1.0 + 0.1 * jax.random.normal(ks[7], (d1,), jnp.float32)
    bn1_beta = 0.1 * jax.random.normal(ks[8], (d1,), jnp.float32)
    bn1_mean = 0.05 * jax.random.normal(ks[9], (d1,), jnp.float32)
    bn1_var = 1.0 + 0.2 * jax.random.uniform(ks[10], (d1,), jnp.float32)

    e1_idx = jax.random.randint(jax.random.PRNGKey(1), (B,), 0, num_entities, dtype=jnp.int32)
    r_idx = jax.random.randint(jax.random.PRNGKey(2), (B,), 0, num_relations, dtype=jnp.int32)

    ref = tucker_reference(e1_idx, r_idx, E, R, W,
                           bn0_gamma, bn0_beta, bn0_mean, bn0_var,
                           bn1_gamma, bn1_beta, bn1_mean, bn1_var)

    # 1) float32 parameter path (tolerance covers TPU default-matmul precision).
    params_f32 = prepare_tucker_params(E, R, W,
                                       bn0_gamma, bn0_beta, bn0_mean, bn0_var,
                                       bn1_gamma, bn1_beta, bn1_mean, bn1_var,
                                       param_dtype=jnp.float32)
    pred_f32 = jax.block_until_ready(tucker_forward(e1_idx, r_idx, params_f32))
    assert pred_f32.shape == (B, num_entities)
    assert np.allclose(np.asarray(pred_f32), np.asarray(ref), atol=5e-3, rtol=5e-3)

    # 2) default bfloat16 parameter path (HBM-optimal; looser tolerance).
    params_bf16 = prepare_tucker_params(E, R, W,
                                        bn0_gamma, bn0_beta, bn0_mean, bn0_var,
                                        bn1_gamma, bn1_beta, bn1_mean, bn1_var)
    pred_bf16 = jax.block_until_ready(tucker_forward(e1_idx, r_idx, params_bf16))
    assert pred_bf16.shape == (B, num_entities)
    assert np.allclose(np.asarray(pred_bf16), np.asarray(ref), atol=3e-2, rtol=3e-2)

    print("KERNEL_OK")
</pallas_src>

<mosaic_0001>
module attributes {stable_mosaic.version = 11 : i64} {
  func.func @_score_kernel(%arg0: i32, %arg1: i32, %arg2: memref<8x32xf32, #tpu.memory_space<vmem>>, %arg3: memref<32x128xf32, #tpu.memory_space<vmem>>, %arg4: memref<8x128xf32, #tpu.memory_space<vmem>>) attributes {dimension_semantics = [#tpu.dimension_semantics<parallel>, #tpu.dimension_semantics<parallel>], iteration_bounds = array<i64: 1, 1>, scalar_prefetch = 0 : i64, scratch_operands = 0 : i64, tpu.core_type = #tpu.core_type<tc>, window_params = [{transform_indices = @transform_0, window_bounds = array<i64: 8, 32>}, {transform_indices = @transform_1, window_bounds = array<i64: 32, 128>}, {transform_indices = @transform_2, window_bounds = array<i64: 8, 128>}]} {
    %c0 = arith.constant 0 : index
    %c0_0 = arith.constant 0 : index
    %0 = vector.load %arg2[%c0, %c0_0] : memref<8x32xf32, #tpu.memory_space<vmem>>, vector<8x32xf32>
    %c0_1 = arith.constant 0 : index
    %c0_2 = arith.constant 0 : index
    %1 = vector.load %arg3[%c0_1, %c0_2] : memref<32x128xf32, #tpu.memory_space<vmem>>, vector<32x128xf32>
    %cst = arith.constant dense<0.000000e+00> : vector<8x128xf32>
    %2 = tpu.matmul %0, %1, %cst {dimension_numbers = #tpu.dot_dimension_numbers<[1], [0], [0], [1], [0, 0, 1, 1], [], []>} : vector<8x32xf32>, vector<32x128xf32>, vector<8x128xf32> -> vector<8x128xf32>
    %3 = arith.negf %2 : vector<8x128xf32>
    %4 = math.exp %3 : vector<8x128xf32>
    %cst_3 = arith.constant 1.000000e+00 : f32
    %5 = vector.broadcast %cst_3 : f32 to vector<8x128xf32>
    %6 = arith.addf %5, %4 : vector<8x128xf32>
    %7 = arith.divf %5, %6 : vector<8x128xf32>
    %c0_4 = arith.constant 0 : index
    %c0_5 = arith.constant 0 : index
    %8 = vector.load %arg4[%c0_4, %c0_5] : memref<8x128xf32, #tpu.memory_space<vmem>>, vector<8x128xf32>
    tpu.vector_store %arg4[%c0_4, %c0_5], %7 {strides = array<i32>} : memref<8x128xf32, #tpu.memory_space<vmem>>, vector<8x128xf32>,
    return
  }
  func.func @transform_0(%arg0: i32, %arg1: i32) -> (i32, i32) {
    %c0_i32 = arith.constant 0 : i32
    %c0_i32_0 = arith.constant 0 : i32
    return %arg1, %c0_i32 : i32, i32
  }
  func.func @transform_1(%arg0: i32, %arg1: i32) -> (i32, i32) {
    %c0_i32 = arith.constant 0 : i32
    %c0_i32_0 = arith.constant 0 : i32
    return %c0_i32, %arg0 : i32, i32
  }
  func.func @transform_2(%arg0: i32, %arg1: i32) -> (i32, i32) {
    %c0_i32 = arith.constant 0 : i32
    return %arg1, %arg0 : i32, i32
  }
}

</mosaic_0001>

<bundles_post_ra>
// kernel: tpu_custom_call.1
= control target key start
LH: loop header
LB: loop body
LE: loop exit
PB: predicated region body
PF: predicated region fallthrough
CT: control target
= control target key end

     0   :  { %7 = vsyncpa [#allocation3], 0  ;;  %s266_s0 = inlined_call_operand.hbm [shape: f32[8,32], index: 0, kind: input, shape index: {}]   ;;  %s267_s1 = inlined_call_operand.hbm [shape: f32[32,128], index: 1, kind: input, shape index: {}]   ;;  %s268_s2 = inlined_call_operand.hbm [shape: f32[8,128], index: 2, kind: output, shape index: {}]  }
   0x1   :  { %8 = vsyncpa [#allocation6], 0 }
   0x2   :  { %9 = vsyncpa [#allocation4], 0  ;;  %s235_s9 = smov [#allocation2]   ;;  %s236_s11 = smov [#allocation5]  }
   0x3   :  { %s16_s10 = sshll.u32 %s235_s9, 4  ;;  %s25_s12 = sshll.u32 %s236_s11, 4  ;;  %s17_s10 = int_to_ptr.vmem [resolvable:$true] %s16_s10  ;;  %s26_s12 = int_to_ptr.vmem [resolvable:$true] %s25_s12 }
   0x4   :  { %s177_s13 = scalar_lea.vmem %s17_s10, 128  ;;  %p182_p1 = scmp.lt.s32.totalorder %s17_s10, %s17_s10 }
   0x5   :  { %p178_p0 = scmp.ne.s32.totalorder %s17_s10, %s177_s13  ;;  %p183_p2 = scmp.lt.s32.totalorder %s177_s13, %s177_s13 }
   0x7   :  { %p184_p3 = por %p183_p2, %p182_p1 }
   0x9   :  { %p185_p4 = pnand %p184_p3, %p178_p0 }
   0xb   :  { %188 = shalt.err (!%p185_p4)
}
   0xc   :  { %19 = dma.hbm_to_vmem [thread:$0]  %s266_s0, 128, %s17_s10, [#allocation3]  }
   0xd   :  { %s197_s16 = scalar_lea.vmem %s26_s12, 512  ;;  %p202_p6 = scmp.lt.s32.totalorder %s26_s12, %s26_s12 }
   0xe   :  { %p198_p5 = scmp.ne.s32.totalorder %s26_s12, %s197_s16  ;;  %p203_p7 = scmp.lt.s32.totalorder %s197_s16, %s197_s16 }
  0x10   :  { %p204_p8 = por %p203_p7, %p202_p6 }
  0x12   :  { %p205_p9 = pnand %p204_p8, %p198_p5 }
  0x14   :  { %208 = shalt.err (!%p205_p9)
}
  0x15   :  { %s237_s17 = smov 128   ;;  %s238_s18 = smov 8  }
  0x16   :  { %31 = dma.hbm_to_vmem [thread:$0]  %s267_s1, 512, %s26_s12, [#allocation6], %s237_s17, %s237_s17, %s238_s18  }
  0x17   :  { %229 = dma.done.wait [#allocation3], 128  }
  0x18   :  { %230 = vsyncadd [#allocation3], 4294967168 }
  0x19   :  { %231 = dma.done.wait [#allocation6], 512  }
  0x1a   :  { %232 = vsyncadd [#allocation6], 4294966784  ;;  %v239_v0 = vmov 0.0   ;;  %vm240_vm0 = vmmov 0   ;;  %v42_v1 = vld [vmem:[#allocation5 + $0x18] sm:$0xff]  ;;  %v41_v2 = vld [vmem:[#allocation5 + $0x10] sm:$0xff] }
  0x1b   :  { %147 = vmatprep.subr.mxu0 %v239_v0  ;;  %155 = vmatprep.mubr.msk.f32.mxu0 %vm240_vm0, %v239_v0  ;;  %v40_v3 = vld [vmem:[#allocation5 + $0x8] sm:$0xff]  ;;  %v39_v4 = vld [vmem:[#allocation5] sm:$0xff]  ;;  %v38_v5 = vld [vmem:[#allocation2] sm:$0xff]  ;;  %vm43_vm1 = vcmask 261120   ;;  %s241_s0 = smov [#allocation7]  }
  0x1c   :  { %148 = vmatpush3.msra.mxu0 %v42_v1  ;;  %s130_s1 = sshll.u32 %s241_s0, 4  ;;  %s131_s1 = int_to_ptr.vmem [resolvable:$true] %s130_s1 }
  0x1d   :  { %149 = vmatprep.subr.mxu0 %v239_v0  ;;  %s209_s21 = scalar_lea.vmem %s131_s1, 128  ;;  %p214_p11 = scmp.lt.s32.totalorder %s131_s1, %s131_s1 }
  0x1e   :  { %150 = vmatpush3.msra.mxu0 %v41_v2  ;;  %p210_p10 = scmp.ne.s32.totalorder %s131_s1, %s209_s21  ;;  %p215_p12 = scmp.lt.s32.totalorder %s209_s21, %s209_s21 }
  0x1f   :  { %151 = vmatprep.subr.mxu0 %v239_v0 }
  0x20   :  { %152 = vmatpush3.msra.mxu0 %v40_v3  ;;  %p216_p13 = por %p215_p12, %p214_p11 }
  0x21   :  { %153 = vmatprep.subr.mxu0 %v239_v0 }
  0x22   :  { %154 = vmatpush3.msra.mxu0 %v39_v4  ;;  %p217_p0 = pnand %p216_p13, %p210_p10 }
  0x23   :  { %156 = vmatmul.mubr.msk.f32.vlgmr.msra.gmra.mxu0 %vm43_vm1, %v38_v5 }
  0xe3   :  { %v113_v6 = vpop.f32.mrf.mxu0 }
  0xe4   :  { %v141_v7 = vmul.f32 -1.442695, %v113_v6 }
  0xe5   :  { %v157_v8 = vpop.f32.mrf.mxu0 }
  0xe6   :  { %165 = vpow2.f32 %v141_v7 }
  0xf3   :  { %v166_v9 = vpop.eup %165 }
  0xf4   :  { %v120_v10 = vadd.f32 1.0, %v166_v9 }
  0xf6   :  { %167 = vrcp.f32 %v120_v10 }
 0x103   :  { %v168_v11 = vpop.eup %167 }
 0x104   :  { %123 = vst [vmem:[#allocation7] sm:$0xff] %v168_v11 }
 0x105   :  { %220 = shalt.err (!%p217_p0)
}
 0x106   :  { %133 = dma.vmem_to_hbm [thread:$0]  %s131_s1, 128, %s268_s2, [#allocation4]  }
 0x107   :  { %233 = dma.done.wait [#allocation4], 128  }
 0x108   :  { %234 = vsyncadd [#allocation4], 4294967168 }
 0x109   :  { %137 = vsyncpa [#allocation3], 1 }
 0x10a   :  { %138 = vsyncpa [#allocation6], 1 }
 0x10b   :  { %139 = vsyncpa [#allocation4], 1 }

</bundles_post_ra>
